<compile_context>
chip_gen: v7x
topology: tpu7x:2x2x1
jax: 0.10.0
libtpu: 0.0.40
codegen_flags: <defaults>
</compile_context>

<pallas_src>
import jax
import jax.numpy as jnp
from jax.experimental import pallas as pl
from jax.experimental.pallas import tpu as pltpu


def _round_up(v, m):
    return (v + m - 1) // m * m


def _cdiv(a, b):
    return -(-a // b)


def _fused_mlp_kernel(xs_ref, r_ref, cls_ref,
                      w1_ref, b1_ref, w2_ref, b2_ref, w3_ref, b3_ref,
                      o_ref):
    # ---- on-chip one-hot feature construction --------------------------------
    # x_rep[b, j] = sorted_load[b, j // (mpl+1)]  (bf16 replication matmul,
    # exact for integer loads <= 255, f32 accumulation)
    x_rep = jnp.dot(xs_ref[...], r_ref[...], preferred_element_type=jnp.float32)
    # feat[b, j] = 1.0 iff x_rep[b, j] == (j % (mpl+1));  padded slots use -1
    feat = jnp.where(jnp.abs(x_rep - cls_ref[...]) < 0.5, 1.0, 0.0
                     ).astype(jnp.bfloat16)
    # ---- layers 1/2: bf16 operands, f32 accumulation --------------------------
    h1 = jnp.dot(feat, w1_ref[...], preferred_element_type=jnp.float32) + b1_ref[...]
    h1 = jnp.maximum(h1, 0.0).astype(jnp.bfloat16)
    h2 = jnp.dot(h1, w2_ref[...], preferred_element_type=jnp.float32) + b2_ref[...]
    h2 = jnp.maximum(h2, 0.0)                    # keep f32 for the tiny final layer
    # ---- final layer fully in f32 (128x128 -> negligible cost) ----------------
    out = jnp.dot(h2, w3_ref[...], preferred_element_type=jnp.float32) + b3_ref[...]
    # bf16 store: halves the dominant HBM traffic (lane-dense 128-wide output)
    o_ref[...] = out.astype(o_ref.dtype)


def _fused_mlp_pallas(xs, r_mat, cls_map, w1, b1, w2, b2, w3, b3, *, tile_b):
    b_pad, n = xs.shape
    in_pad = r_mat.shape[1]
    h1 = w1.shape[1]
    h2 = w2.shape[1]
    outp = w3.shape[1]
    grid = (b_pad // tile_b,)

    def const_spec(shape):
        # constant index_map -> stays VMEM-resident across grid steps
        return pl.BlockSpec(shape, lambda i: (0,) * len(shape))

    flops = 2 * b_pad * (n * in_pad + in_pad * h1 + h1 * h2 + h2 * outp)
    bytes_accessed = (xs.size * 2                      # bf16 sorted loads
                      + r_mat.size * 2 + cls_map.size * 4
                      + (w1.size + w2.size) * 2        # bf16 weights
                      + w3.size * 4                    # f32 final weights
                      + (b1.size + b2.size + b3.size) * 4
                      + b_pad * outp * 2)              # bf16 output

    return pl.pallas_call(
        _fused_mlp_kernel,
        out_shape=jax.ShapeDtypeStruct((b_pad, outp), jnp.bfloat16),
        grid=grid,
        in_specs=[
            pl.BlockSpec((tile_b, n), lambda i: (i, 0)),   # sorted loads (batch tile)
            const_spec((n, in_pad)),                       # replication matrix R (bf16)
            const_spec((1, in_pad)),                       # class map (f32)
            const_spec((in_pad, h1)), const_spec((1, h1)),
            const_spec((h1, h2)),     const_spec((1, h2)),
            const_spec((h2, outp)),   const_spec((1, outp)),
        ],
        out_specs=pl.BlockSpec((tile_b, outp), lambda i: (i, 0)),
        compiler_params=pltpu.CompilerParams(
            dimension_semantics=("parallel",),
            vmem_limit_bytes=32 * 1024 * 1024,
        ),
        cost_estimate=pl.CostEstimate(
            flops=flops, transcendentals=0, bytes_accessed=bytes_accessed),
    )(xs, r_mat, cls_map, w1, b1, w2, b2, w3, b3)


class FullTwoThinningOneHotNetPallas:
    # tile_b cap: ~14 MiB VMEM footprint at 4096, fits the 32 MiB scoped default
    # on v5e/v6e/v7x (v7x physical VMEM is 64 MiB).
    _TILE_CAP = 4096

    def __init__(self, n, max_threshold, max_possible_load,
                 inner1_size=None, inner2_size=None, key=None):
        # bf16 sorted-load / one-hot path is integer-exact only up to 255
        assert max_possible_load <= 255, \
            "bf16 one-hot path requires max_possible_load <= 255"

        self.n = n
        self.max_threshold = max_threshold
        self.max_possible_load = max_possible_load
        self.inner1_size = inner1_size if inner1_size else max(
            max_threshold + 1, n // 2 * (max_possible_load + 1) // 2)
        self.inner2_size = inner2_size if inner2_size else max(
            max_threshold + 1, self.inner1_size // 4)
        self.in_dim = n * (max_possible_load + 1)
        self.out_dim = max_threshold + 1

        # lane-padded kernel dims (multiples of 128)
        self.in_pad = _round_up(self.in_dim, 128)
        self.h1_pad = _round_up(self.inner1_size, 128)
        self.h2_pad = _round_up(self.inner2_size, 128)
        self.out_pad = _round_up(self.out_dim, 128)

        if key is None:
            key = jax.random.PRNGKey(42)
        k = jax.random.split(key, 6)

        def linear_init(kw, kb, fan_in, fan_out):
            # deterministic init mimicking torch.nn.Linear: U(-1/sqrt(fan_in), ...)
            bound = 1.0 / float(fan_in) ** 0.5
            w = jax.random.uniform(kw, (fan_in, fan_out), jnp.float32, -bound, bound)
            b = jax.random.uniform(kb, (1, fan_out), jnp.float32, -bound, bound)
            return w, b

        # logical (unpadded, f32) weights — kept for reference checks
        self.w1, self.b1 = linear_init(k[0], k[1], self.in_dim, self.inner1_size)
        self.w2, self.b2 = linear_init(k[2], k[3], self.inner1_size, self.inner2_size)
        self.w3, self.b3 = linear_init(k[4], k[5], self.inner2_size, self.out_dim)

        # padded weights / biases consumed by the kernel
        def pad_w(w, rpad, cpad, dtype):
            full = jnp.zeros((rpad, cpad), jnp.float32).at[:w.shape[0], :w.shape[1]].set(w)
            return full.astype(dtype)

        def pad_b(b, cpad):
            return jnp.zeros((1, cpad), jnp.float32).at[:, :b.shape[1]].set(b)

        self.w1p = pad_w(self.w1, self.in_pad, self.h1_pad, jnp.bfloat16)
        self.w2p = pad_w(self.w2, self.h1_pad, self.h2_pad, jnp.bfloat16)
        self.w3p = pad_w(self.w3, self.h2_pad, self.out_pad, jnp.float32)   # final layer in f32
        self.b1p = pad_b(self.b1, self.h1_pad)
        self.b2p = pad_b(self.b2, self.h2_pad)
        self.b3p = pad_b(self.b3, self.out_pad)

        # helpers for the in-kernel one-hot (PyTorch ball-major flatten order)
        C = max_possible_load + 1
        j = jnp.arange(self.in_pad)
        valid = j < self.in_dim
        ball = j // C
        self.r_mat = jnp.where(
            valid[None, :] & (ball[None, :] == jnp.arange(n)[:, None]),
            1.0, 0.0).astype(jnp.bfloat16)                                   # (n, in_pad)
        self.cls_map = jnp.where(valid, (j % C).astype(jnp.float32),
                                 -1.0)[None, :].astype(jnp.float32)          # (1, in_pad)

    def _choose_tiling(self, b):
        """Pick (tile_b, b_pad): amortize per-step overhead, limit padding waste,
        keep >=2 grid steps for v7x megacore when the batch allows it."""
        cap = self._TILE_CAP
        if b <= 256:
            # single tile; block == full array so no extra alignment constraints
            tile_b = _round_up(b, 16)
            return tile_b, tile_b
        # >= 2 grid steps and M rounded to 256 (v6e/v7x MXU is 2x256^2)
        n_tiles = max(2, _cdiv(b, cap))
        tile_b = min(cap, _round_up(_cdiv(b, n_tiles), 256))
        b_pad = _round_up(b, tile_b)
        return tile_b, b_pad

    def __call__(self, x):
        # x: (batch, n) integer loads
        xs = jnp.sort(x, axis=-1).astype(jnp.bfloat16)       # x.sort()[0], bf16 DMA
        b = xs.shape[0]
        tile_b, b_pad = self._choose_tiling(b)
        if b_pad != b:
            xs = jnp.pad(xs, ((0, b_pad - b), (0, 0)))
        out = _fused_mlp_pallas(xs, self.r_mat, self.cls_map,
                                self.w1p, self.b1p, self.w2p, self.b2p,
                                self.w3p, self.b3p, tile_b=tile_b)
        return out[:b, :self.out_dim].astype(jnp.float32)


# ---------------- pure-JAX references (for correctness checking) -------------
def _reference_f32(model, x):
    C = model.max_possible_load + 1
    hp = jax.lax.Precision.HIGHEST
    xs = jnp.sort(x, axis=-1)
    feat = jax.nn.one_hot(xs, C, dtype=jnp.float32).reshape(-1, model.in_dim)
    h1 = jnp.maximum(jnp.dot(feat, model.w1, precision=hp) + model.b1, 0.0)
    h2 = jnp.maximum(jnp.dot(h1, model.w2, precision=hp) + model.b2, 0.0)
    return jnp.dot(h2, model.w3, precision=hp) + model.b3


def _reference_bf16_emulated(model, x):
    # emulates the kernel's numerics: bf16 operands for layers 1/2, f32 final
    # layer, f32 accumulation everywhere, bf16 output rounding.
    C = model.max_possible_load + 1
    hp = jax.lax.Precision.HIGHEST
    f = lambda a: a.astype(jnp.bfloat16).astype(jnp.float32)
    xs = jnp.sort(x, axis=-1)
    feat = jax.nn.one_hot(xs, C, dtype=jnp.float32).reshape(-1, model.in_dim)
    h1 = jnp.maximum(jnp.dot(f(feat), f(model.w1), precision=hp) + model.b1, 0.0)
    h2 = jnp.maximum(jnp.dot(f(h1), f(model.w2), precision=hp) + model.b2, 0.0)
    out = jnp.dot(h2, model.w3, precision=hp) + model.b3
    return out.astype(jnp.bfloat16).astype(jnp.float32)


if __name__ == "__main__":
    # small, self-consistent shapes
    n = 8
    max_possible_load = 10
    max_threshold = 4
    batch = 2

    key = jax.random.PRNGKey(0)
    k_x, k_x2, k_params = jax.random.split(key, 3)

    # integer "ball loads" in [0, max_possible_load]
    x = jax.random.randint(k_x, (batch, n), 0, max_possible_load + 1, dtype=jnp.int32)

    model = FullTwoThinningOneHotNetPallas(n, max_threshold, max_possible_load,
                                           key=k_params)

    out = jax.block_until_ready(model(x))
    assert out.shape == (batch, max_threshold + 1)

    ref_em = _reference_bf16_emulated(model, x)    # same numerics as the kernel
    ref_f32 = _reference_f32(model, x)             # full-f32 module semantics
    assert jnp.allclose(out, ref_em, atol=3e-2, rtol=3e-2)
    assert jnp.allclose(out, ref_f32, atol=1e-1, rtol=1e-1)

    # second check: batch large enough to exercise grid > 1 and batch padding
    batch2 = 300
    x2 = jax.random.randint(k_x2, (batch2, n), 0, max_possible_load + 1,
                            dtype=jnp.int32)
    out2 = jax.block_until_ready(model(x2))
    assert out2.shape == (batch2, max_threshold + 1)
    ref2 = _reference_bf16_emulated(model, x2)
    assert jnp.allclose(out2, ref2, atol=3e-2, rtol=3e-2)

    print("KERNEL_OK")
</pallas_src>

<mosaic_0001>
module attributes {stable_mosaic.version = 11 : i64} {
  func.func @_fused_mlp_kernel(%arg0: i32, %arg1: memref<16x8xbf16, #tpu.memory_space<vmem>>, %arg2: memref<8x128xbf16, #tpu.memory_space<vmem>>, %arg3: memref<1x128xf32, #tpu.memory_space<vmem>>, %arg4: memref<128x128xbf16, #tpu.memory_space<vmem>>, %arg5: memref<1x128xf32, #tpu.memory_space<vmem>>, %arg6: memref<128x128xbf16, #tpu.memory_space<vmem>>, %arg7: memref<1x128xf32, #tpu.memory_space<vmem>>, %arg8: memref<128x128xf32, #tpu.memory_space<vmem>>, %arg9: memref<1x128xf32, #tpu.memory_space<vmem>>, %arg10: memref<16x128xbf16, #tpu.memory_space<vmem>>) attributes {dimension_semantics = [#tpu.dimension_semantics<parallel>], iteration_bounds = array<i64: 1>, scalar_prefetch = 0 : i64, scratch_operands = 0 : i64, tpu.core_type = #tpu.core_type<tc>, window_params = [{transform_indices = @transform_0, window_bounds = array<i64: 16, 8>}, {pipeline_mode = #tpu.pipeline_mode<synchronous>, transform_indices = @transform_1, window_bounds = array<i64: 8, 128>}, {pipeline_mode = #tpu.pipeline_mode<synchronous>, transform_indices = @transform_2, window_bounds = array<i64: 1, 128>}, {pipeline_mode = #tpu.pipeline_mode<synchronous>, transform_indices = @transform_3, window_bounds = array<i64: 128, 128>}, {pipeline_mode = #tpu.pipeline_mode<synchronous>, transform_indices = @transform_4, window_bounds = array<i64: 1, 128>}, {pipeline_mode = #tpu.pipeline_mode<synchronous>, transform_indices = @transform_5, window_bounds = array<i64: 128, 128>}, {pipeline_mode = #tpu.pipeline_mode<synchronous>, transform_indices = @transform_6, window_bounds = array<i64: 1, 128>}, {pipeline_mode = #tpu.pipeline_mode<synchronous>, transform_indices = @transform_7, window_bounds = array<i64: 128, 128>}, {pipeline_mode = #tpu.pipeline_mode<synchronous>, transform_indices = @transform_8, window_bounds = array<i64: 1, 128>}, {transform_indices = @transform_9, window_bounds = array<i64: 16, 128>}]} {
    %c0 = arith.constant 0 : index
    %c0_0 = arith.constant 0 : index
    %0 = vector.load %arg1[%c0, %c0_0] : memref<16x8xbf16, #tpu.memory_space<vmem>>, vector<16x8xbf16>
    %c0_1 = arith.constant 0 : index
    %c0_2 = arith.constant 0 : index
    %1 = vector.load %arg2[%c0_1, %c0_2] : memref<8x128xbf16, #tpu.memory_space<vmem>>, vector<8x128xbf16>
    %cst = arith.constant dense<0.000000e+00> : vector<16x128xf32>
    %2 = tpu.matmul %0, %1, %cst {dimension_numbers = #tpu.dot_dimension_numbers<[1], [0], [0], [1], [0, 0, 1, 1], [], []>} : vector<16x8xbf16>, vector<8x128xbf16>, vector<16x128xf32> -> vector<16x128xf32>
    %c0_3 = arith.constant 0 : index
    %c0_4 = arith.constant 0 : index
    %3 = vector.load %arg3[%c0_3, %c0_4] : memref<1x128xf32, #tpu.memory_space<vmem>>, vector<1x128xf32>
    %4 = vector.broadcast %3 : vector<1x128xf32> to vector<16x128xf32>
    %5 = arith.subf %2, %4 : vector<16x128xf32>
    %6 = math.absf %5 : vector<16x128xf32>
    %cst_5 = arith.constant 5.000000e-01 : f32
    %7 = vector.broadcast %cst_5 : f32 to vector<16x128xf32>
    %8 = arith.cmpf olt, %6, %7 : vector<16x128xf32>
    %cst_6 = arith.constant 1.000000e+00 : f32
    %cst_7 = arith.constant 0.000000e+00 : f32
    %9 = vector.broadcast %cst_6 : f32 to vector<16x128xf32>
    %10 = vector.broadcast %cst_7 : f32 to vector<16x128xf32>
    %11 = arith.select %8, %9, %10 : vector<16x128xi1>, vector<16x128xf32>
    %12 = arith.truncf %11 : vector<16x128xf32> to vector<16x128xbf16>
    %c0_8 = arith.constant 0 : index
    %c0_9 = arith.constant 0 : index
    %13 = vector.load %arg4[%c0_8, %c0_9] : memref<128x128xbf16, #tpu.memory_space<vmem>>, vector<128x128xbf16>
    %cst_10 = arith.constant dense<0.000000e+00> : vector<16x128xf32>
    %14 = tpu.matmul %12, %13, %cst_10 {dimension_numbers = #tpu.dot_dimension_numbers<[1], [0], [0], [1], [0, 0, 1, 1], [], []>} : vector<16x128xbf16>, vector<128x128xbf16>, vector<16x128xf32> -> vector<16x128xf32>
    %c0_11 = arith.constant 0 : index
    %c0_12 = arith.constant 0 : index
    %15 = vector.load %arg5[%c0_11, %c0_12] : memref<1x128xf32, #tpu.memory_space<vmem>>, vector<1x128xf32>
    %16 = vector.broadcast %15 : vector<1x128xf32> to vector<16x128xf32>
    %17 = arith.addf %14, %16 : vector<16x128xf32>
    %cst_13 = arith.constant 0.000000e+00 : f32
    %18 = vector.broadcast %cst_13 : f32 to vector<16x128xf32>
    %19 = arith.maximumf %17, %18 : vector<16x128xf32>
    %20 = arith.truncf %19 : vector<16x128xf32> to vector<16x128xbf16>
    %c0_14 = arith.constant 0 : index
    %c0_15 = arith.constant 0 : index
    %21 = vector.load %arg6[%c0_14, %c0_15] : memref<128x128xbf16, #tpu.memory_space<vmem>>, vector<128x128xbf16>
    %cst_16 = arith.constant dense<0.000000e+00> : vector<16x128xf32>
    %22 = tpu.matmul %20, %21, %cst_16 {dimension_numbers = #tpu.dot_dimension_numbers<[1], [0], [0], [1], [0, 0, 1, 1], [], []>} : vector<16x128xbf16>, vector<128x128xbf16>, vector<16x128xf32> -> vector<16x128xf32>
    %c0_17 = arith.constant 0 : index
    %c0_18 = arith.constant 0 : index
    %23 = vector.load %arg7[%c0_17, %c0_18] : memref<1x128xf32, #tpu.memory_space<vmem>>, vector<1x128xf32>
    %24 = vector.broadcast %23 : vector<1x128xf32> to vector<16x128xf32>
    %25 = arith.addf %22, %24 : vector<16x128xf32>
    %cst_19 = arith.constant 0.000000e+00 : f32
    %26 = vector.broadcast %cst_19 : f32 to vector<16x128xf32>
    %27 = arith.maximumf %25, %26 : vector<16x128xf32>
    %c0_20 = arith.constant 0 : index
    %c0_21 = arith.constant 0 : index
    %28 = vector.load %arg8[%c0_20, %c0_21] : memref<128x128xf32, #tpu.memory_space<vmem>>, vector<128x128xf32>
    %cst_22 = arith.constant dense<0.000000e+00> : vector<16x128xf32>
    %29 = tpu.matmul %27, %28, %cst_22 {dimension_numbers = #tpu.dot_dimension_numbers<[1], [0], [0], [1], [0, 0, 1, 1], [], []>} : vector<16x128xf32>, vector<128x128xf32>, vector<16x128xf32> -> vector<16x128xf32>
    %c0_23 = arith.constant 0 : index
    %c0_24 = arith.constant 0 : index
    %30 = vector.load %arg9[%c0_23, %c0_24] : memref<1x128xf32, #tpu.memory_space<vmem>>, vector<1x128xf32>
    %31 = vector.broadcast %30 : vector<1x128xf32> to vector<16x128xf32>
    %32 = arith.addf %29, %31 : vector<16x128xf32>
    %33 = arith.truncf %32 : vector<16x128xf32> to vector<16x128xbf16>
    %c0_25 = arith.constant 0 : index
    %c0_26 = arith.constant 0 : index
    %34 = vector.load %arg10[%c0_25, %c0_26] : memref<16x128xbf16, #tpu.memory_space<vmem>>, vector<16x128xbf16>
    tpu.vector_store %arg10[%c0_25, %c0_26], %33 {strides = array<i32>} : memref<16x128xbf16, #tpu.memory_space<vmem>>, vector<16x128xbf16>,
    return
  }
  func.func @transform_0(%arg0: i32) -> (i32, i32) {
    %c0_i32 = arith.constant 0 : i32
    %c0_i32_0 = arith.constant 0 : i32
    return %arg0, %c0_i32 : i32, i32
  }
  func.func @transform_1(%arg0: i32) -> (i32, i32) {
    %c0_i32 = arith.constant 0 : i32
    %c0_i32_0 = arith.constant 0 : i32
    %c0_i32_1 = arith.constant 0 : i32
    return %c0_i32, %c0_i32_0 : i32, i32
  }
  func.func @transform_2(%arg0: i32) -> (i32, i32) {
    %c0_i32 = arith.constant 0 : i32
    %c0_i32_0 = arith.constant 0 : i32
    %c0_i32_1 = arith.constant 0 : i32
    return %c0_i32, %c0_i32_0 : i32, i32
  }
  func.func @transform_3(%arg0: i32) -> (i32, i32) {
    %c0_i32 = arith.constant 0 : i32
    %c0_i32_0 = arith.constant 0 : i32
    %c0_i32_1 = arith.constant 0 : i32
    return %c0_i32, %c0_i32_0 : i32, i32
  }
  func.func @transform_4(%arg0: i32) -> (i32, i32) {
    %c0_i32 = arith.constant 0 : i32
    %c0_i32_0 = arith.constant 0 : i32
    %c0_i32_1 = arith.constant 0 : i32
    return %c0_i32, %c0_i32_0 : i32, i32
  }
  func.func @transform_5(%arg0: i32) -> (i32, i32) {
    %c0_i32 = arith.constant 0 : i32
    %c0_i32_0 = arith.constant 0 : i32
    %c0_i32_1 = arith.constant 0 : i32
    return %c0_i32, %c0_i32_0 : i32, i32
  }
  func.func @transform_6(%arg0: i32) -> (i32, i32) {
    %c0_i32 = arith.constant 0 : i32
    %c0_i32_0 = arith.constant 0 : i32
    %c0_i32_1 = arith.constant 0 : i32
    return %c0_i32, %c0_i32_0 : i32, i32
  }
  func.func @transform_7(%arg0: i32) -> (i32, i32) {
    %c0_i32 = arith.constant 0 : i32
    %c0_i32_0 = arith.constant 0 : i32
    %c0_i32_1 = arith.constant 0 : i32
    return %c0_i32, %c0_i32_0 : i32, i32
  }
  func.func @transform_8(%arg0: i32) -> (i32, i32) {
    %c0_i32 = arith.constant 0 : i32
    %c0_i32_0 = arith.constant 0 : i32
    %c0_i32_1 = arith.constant 0 : i32
    return %c0_i32, %c0_i32_0 : i32, i32
  }
  func.func @transform_9(%arg0: i32) -> (i32, i32) {
    %c0_i32 = arith.constant 0 : i32
    %c0_i32_0 = arith.constant 0 : i32
    return %arg0, %c0_i32 : i32, i32
  }
}

</mosaic_0001>

<bundles_post_ra>
// kernel: tpu_custom_call.1
= control target key start
LH: loop header
LB: loop body
LE: loop exit
PB: predicated region body
PF: predicated region fallthrough
CT: control target
= control target key end

     0   :  { %14 = vsyncpa [#allocation3], 0  ;;  %s975_s0 = inlined_call_operand.vmem [shape: bf16[16,8], index: 0, kind: input, shape index: {}]   ;;  %s976_s1 = inlined_call_operand.vmem [shape: bf16[8,128], index: 1, kind: input, shape index: {}]   ;;  %s977_s2 = inlined_call_operand.vmem [shape: f32[1,128], index: 2, kind: input, shape index: {}]   ;;  %s978_s3 = inlined_call_operand.hbm [shape: bf16[128,128], index: 3, kind: input, shape index: {}]   ;;  %s979_s4 = inlined_call_operand.vmem [shape: f32[1,128], index: 4, kind: input, shape index: {}]   ;;  %s980_s5 = inlined_call_operand.hbm [shape: bf16[128,128], index: 5, kind: input, shape index: {}]   ;;  %s981_s6 = inlined_call_operand.vmem [shape: f32[1,128], index: 6, kind: input, shape index: {}]   ;;  %s982_s7 = inlined_call_operand.hbm [shape: f32[128,128], index: 7, kind: input, shape index: {}]   ;;  %s983_s8 = inlined_call_operand.vmem [shape: f32[1,128], index: 8, kind: input, shape index: {}]   ;;  %s984_s9 = inlined_call_operand.hbm [shape: bf16[16,128], index: 9, kind: output, shape index: {}]  }
   0x1   :  { %15 = vsyncpa [#allocation6], 0 }
   0x2   :  { %16 = vsyncpa [#allocation4], 0  ;;  %s809_s30 = smov [#allocation5]   ;;  %s810_s11 = smov [#allocation2]  }
   0x3   :  { %s42_s10 = sshll.u32 %s809_s30, 4  ;;  %s28_s12 = sshll.u32 %s810_s11, 4  ;;  %s43_s10 = int_to_ptr.vmem [resolvable:$true] %s42_s10  ;;  %s870_s12 = int_to_ptr.vmem [resolvable:$true] %s28_s12 }
   0x4   :  { %s715_s15 = scalar_lea.hbm %s980_s5, 1024 }
   0x5   :  { %p716_p0 = scmp.ne.s32.totalorder %s980_s5, %s715_s15  ;;  %p719_p1 = scmp.lt.u32.totalorder %s715_s15, %s980_s5 }
   0x7   :  { %p721_p2 = pnand %p719_p1, %p716_p0 }
   0x9   :  { %724 = shalt.err (!%p721_p2)
}
   0xa   :  { %s725_s20 = scalar_lea.vmem %s43_s10, 1024  ;;  %p730_p4 = scmp.lt.s32.totalorder %s43_s10, %s43_s10 }
   0xb   :  { %p726_p3 = scmp.ne.s32.totalorder %s43_s10, %s725_s20  ;;  %p731_p5 = scmp.lt.s32.totalorder %s725_s20, %s725_s20 }
   0xd   :  { %p732_p6 = por %p731_p5, %p730_p4 }
   0xf   :  { %p733_p7 = pnand %p732_p6, %p726_p3 }
  0x11   :  { %736 = shalt.err (!%p733_p7)
}
  0x12   :  { %s811_s21 = smov 64   ;;  %s812_s22 = smov 4  }
  0x13   :  { %48 = dma.hbm_to_vmem [thread:$0]  %s980_s5, 1024, %s43_s10, [#allocation6], %s811_s21, %s811_s21, %s812_s22  }
  0x14   :  { %s737_s27 = scalar_lea.hbm %s978_s3, 1024 }
  0x15   :  { %p738_p8 = scmp.ne.s32.totalorder %s978_s3, %s737_s27  ;;  %p741_p9 = scmp.lt.u32.totalorder %s737_s27, %s978_s3 }
  0x17   :  { %p743_p10 = pnand %p741_p9, %p738_p8 }
  0x19   :  { %746 = shalt.err (!%p743_p10)
}
  0x1a   :  { %s747_s13 = scalar_lea.vmem %s870_s12, 1024  ;;  %p752_p12 = scmp.lt.s32.totalorder %s870_s12, %s870_s12 }
  0x1b   :  { %p748_p11 = scmp.ne.s32.totalorder %s870_s12, %s747_s13  ;;  %p753_p13 = scmp.lt.s32.totalorder %s747_s13, %s747_s13 }
  0x1d   :  { %p754_p0 = por %p753_p13, %p752_p12 }
  0x1f   :  { %p755_p1 = pnand %p754_p0, %p748_p11 }
  0x21   :  { %758 = shalt.err (!%p755_p1)
}
  0x22   :  { %34 = dma.hbm_to_vmem [thread:$0]  %s978_s3, 1024, %s870_s12, [#allocation3], %s811_s21, %s811_s21, %s812_s22  }
  0x23   :  { %s813_s14 = smov [#allocation7]   ;;  %s759_s18 = scalar_lea.hbm %s982_s7, 2048 }
  0x24   :  { %s56_s15 = sshll.u32 %s813_s14, 4  ;;  %p760_p2 = scmp.ne.s32.totalorder %s982_s7, %s759_s18  ;;  %s57_s15 = int_to_ptr.vmem [resolvable:$true] %s56_s15 }
  0x25   :  { %p763_p3 = scmp.lt.u32.totalorder %s759_s18, %s982_s7 }
  0x27   :  { %p765_p4 = pnand %p763_p3, %p760_p2 }
  0x29   :  { %768 = shalt.err (!%p765_p4)
}
  0x2a   :  { %s769_s25 = scalar_lea.vmem %s57_s15, 2048  ;;  %p774_p6 = scmp.lt.s32.totalorder %s57_s15, %s57_s15 }
  0x2b   :  { %p770_p5 = scmp.ne.s32.totalorder %s57_s15, %s769_s25  ;;  %p775_p7 = scmp.lt.s32.totalorder %s769_s25, %s769_s25 }
  0x2d   :  { %p776_p8 = por %p775_p7, %p774_p6 }
  0x2f   :  { %p777_p9 = pnand %p776_p8, %p770_p5 }
  0x31   :  { %780 = shalt.err (!%p777_p9)
}
  0x32   :  { %s814_s3 = smov 128   ;;  %s815_s12 = smov 8  }
  0x33   :  { %62 = dma.hbm_to_vmem [thread:$0]  %s982_s7, 2048, %s57_s15, [#allocation6], %s814_s3, %s814_s3, %s815_s12  }
  0x34   :  { %803 = dma.done.wait [#allocation3], 1024  }
  0x35   :  { %804 = vsyncadd [#allocation3], 4294966272 }
  0x36   :  { %805 = dma.done.wait [#allocation6], 3072  }
  0x37   :  { %806 = vsyncadd [#allocation6], 4294964224  ;;  %v816_v0 = vmov 0.0   ;;  %vm817_vm0 = vmmov 0   ;;  %vm87_vm1 = vcmask 1043456   ;;  %v698_v3 = vld [vmem:[%s975_s0] sm:$0xff]  }
  0x38   :  { %574 = vmatprep.subr.bf16.mxu0 %v816_v0  ;;  %576 = vmatprep.mubr.msk.bf16.mxu0 %vm817_vm0, %v816_v0  ;;  %v77_v1 = vld [vmem:[%s976_s1] sm:$0xf]  ;;  %vm83_vm2 = vcmask 64512   ;;  %v699_v4 = vld [vmem:[#allocation2] sm:$0xff]   ;;  %v700_v5 = vld [vmem:[#allocation2 + $0x8] sm:$0xff]   ;;  %s819_s14 = smov [#allocation8]  }
  0x39   :  { %580 = vmatprep.subr.bf16.mxu1 %v816_v0  ;;  %596 = vmatprep.mubr.msk.bf16.mxu1 %vm817_vm0, %v816_v0  ;;  %v89_v2 = vsel %vm87_vm1, %v77_v1, 0  ;;  %v701_v6 = vld [vmem:[#allocation2 + $0x10] sm:$0xff]   ;;  %v702_v7 = vld [vmem:[#allocation2 + $0x18] sm:$0xff]   ;;  %v703_v8 = vld [vmem:[#allocation2 + $0x20] sm:$0xff]   ;;  %v818_v27 = vmov 1.0|1.0  }
  0x3a   :  { %575 = vmatpush3.bf16.msra.mxu0 %v89_v2  ;;  %581 = vmatpush3.bf16.msra.mxu1 %v699_v4  ;;  %v704_v9 = vld [vmem:[#allocation2 + $0x28] sm:$0xff]   ;;  %v705_v10 = vld [vmem:[#allocation2 + $0x30] sm:$0xff]   ;;  %v706_v11 = vld [vmem:[#allocation2 + $0x38] sm:$0xff]   ;;  %s490_s15 = sshll.u32 %s819_s14, 4  ;;  %s491_s15 = int_to_ptr.vmem [resolvable:$true] %s490_s15 }
  0x3b   :  { %600 = vmatprep.subr.bf16.mxu0 %v816_v0  ;;  %582 = vmatprep.subr.bf16.mxu1 %v816_v0  ;;  %v707_v12 = vld [vmem:[#allocation5] sm:$0xff]   ;;  %v708_v13 = vld [vmem:[#allocation5 + $0x8] sm:$0xff]   ;;  %v709_v14 = vld [vmem:[#allocation5 + $0x10] sm:$0xff]   ;;  %p786_p11 = scmp.lt.s32.totalorder %s491_s15, %s491_s15 }
  0x3c   :  { %v710_v15 = vld [vmem:[#allocation5 + $0x18] sm:$0xff]   ;;  %v711_v16 = vld [vmem:[#allocation5 + $0x20] sm:$0xff]   ;;  %v712_v17 = vld [vmem:[#allocation5 + $0x28] sm:$0xff]  }
  0x3d   :  { %577 = vmatmul.mubr.msk.bf16.vlgmr.msra.gmra.mrb[0].mxu0 %vm83_vm2, %v698_v3  ;;  %v505_v18 = vld [vmem:[%s977_s2] ss:$0 sm:$0xff]  ;;  %v714_v29 = vld [vmem:[#allocation5 + $0x38] sm:$0xff]   ;;  %v377_v30 = vld [vmem:[#allocation7] sm:$0xff] }
  0x3e   :  { %616 = vmatprep.mubr.msk.bf16.mxu0 %vm817_vm0, %v816_v0  ;;  %583 = vmatpush3.bf16.msra.mxu1 %v700_v5  ;;  %v713_v28 = vld [vmem:[#allocation5 + $0x30] sm:$0xff]   ;;  %v378_v31 = vld [vmem:[#allocation7 + $0x8] sm:$0xff]  ;;  %v380_v34 = vld [vmem:[#allocation7 + $0x18] sm:$0xff] }
  0x3f   :  { %584 = vmatprep.subr.bf16.mxu1 %v816_v0  ;;  %601 = vmatpush3.bf16.msra.mxu0 %v707_v12  ;;  %v379_v32 = vld [vmem:[#allocation7 + $0x10] sm:$0xff]  ;;  %v655_v33 = vpack.c.bf16 %v378_v31, %v377_v30  ;;  %v381_v36 = vld [vmem:[#allocation7 + $0x20] sm:$0xff]  ;;  %v382_v37 = vld [vmem:[#allocation7 + $0x28] sm:$0xff] }
  0x40   :  { %602 = vmatprep.subr.bf16.mxu0 %v816_v0  ;;  %v659_v35 = vpack.c.bf16 %v380_v34, %v379_v32  ;;  %v663_v38 = vpack.c.bf16 %v382_v37, %v381_v36  ;;  %v383_v39 = vld [vmem:[#allocation7 + $0x30] sm:$0xff]  ;;  %v384_v40 = vld [vmem:[#allocation7 + $0x38] sm:$0xff]  ;;  %v385_v42 = vld [vmem:[#allocation7 + $0x40] sm:$0xff] }
  0x41   :  { %v667_v41 = vpack.c.bf16 %v384_v40, %v383_v39  ;;  %v386_v43 = vld [vmem:[#allocation7 + $0x48] sm:$0xff]  ;;  %v387_v45 = vld [vmem:[#allocation7 + $0x50] sm:$0xff]  ;;  %v388_v46 = vld [vmem:[#allocation7 + $0x58] sm:$0xff] }
  0x42   :  { %585 = vmatpush3.bf16.msra.mxu1 %v701_v6  ;;  %v671_v44 = vpack.c.bf16 %v386_v43, %v385_v42  ;;  %v675_v47 = vpack.c.bf16 %v388_v46, %v387_v45  ;;  %v389_v48 = vld [vmem:[#allocation7 + $0x60] sm:$0xff]  ;;  %v390_v49 = vld [vmem:[#allocation7 + $0x68] sm:$0xff]  ;;  %v506_v51 = vld [vmem:[%s979_s4] ss:$0 sm:$0xff] }
  0x43   :  { %586 = vmatprep.subr.bf16.mxu1 %v816_v0  ;;  %603 = vmatpush3.bf16.msra.mxu0 %v708_v13  ;;  %v679_v50 = vpack.c.bf16 %v390_v49, %v389_v48  ;;  %v391_v61 = vld [vmem:[#allocation7 + $0x70] sm:$0xff]  ;;  %v392_v62 = vld [vmem:[#allocation7 + $0x78] sm:$0xff] }
  0x44   :  { %604 = vmatprep.subr.bf16.mxu0 %v816_v0  ;;  %v683_v63 = vpack.c.bf16 %v392_v62, %v391_v61 }
  0x46   :  { %587 = vmatpush3.bf16.msra.mxu1 %v702_v7 }
  0x47   :  { %588 = vmatprep.subr.bf16.mxu1 %v816_v0  ;;  %605 = vmatpush3.bf16.msra.mxu0 %v709_v14 }
  0x48   :  { %606 = vmatprep.subr.bf16.mxu0 %v816_v0 }
  0x4a   :  { %589 = vmatpush3.bf16.msra.mxu1 %v703_v8 }
  0x4b   :  { %590 = vmatprep.subr.bf16.mxu1 %v816_v0  ;;  %607 = vmatpush3.bf16.msra.mxu0 %v710_v15 }
  0x4c   :  { %608 = vmatprep.subr.bf16.mxu0 %v816_v0 }
  0x4e   :  { %591 = vmatpush3.bf16.msra.mxu1 %v704_v9  ;;  %v526_v9 = vld [vmem:[%s983_s8] ss:$0 sm:$0xff] }
  0x4f   :  { %592 = vmatprep.subr.bf16.mxu1 %v816_v0  ;;  %609 = vmatpush3.bf16.msra.mxu0 %v711_v16 }
  0x50   :  { %610 = vmatprep.subr.bf16.mxu0 %v816_v0 }
  0x52   :  { %593 = vmatpush3.bf16.msra.mxu1 %v705_v10 }
  0x53   :  { %594 = vmatprep.subr.bf16.mxu1 %v816_v0  ;;  %611 = vmatpush3.bf16.msra.mxu0 %v712_v17 }
  0x54   :  { %612 = vmatprep.subr.bf16.mxu0 %v816_v0 }
  0x56   :  { %595 = vmatpush3.bf16.msra.mxu1 %v706_v11 }
  0x57   :  { %613 = vmatpush3.bf16.msra.mxu0 %v713_v28  ;;  %656 = vmatprep.subr.bf16.mxu1 %v655_v33 }
  0x58   :  { %614 = vmatprep.subr.bf16.mxu0 %v816_v0  ;;  %v517_v0 = vld [vmem:[%s981_s6] ss:$0 sm:$0xff]  ;;  %s781_s6 = scalar_lea.vmem %s491_s15, 128 }
  0x59   :  { %p782_p10 = scmp.ne.s32.totalorder %s491_s15, %s781_s6  ;;  %p787_p12 = scmp.lt.s32.totalorder %s781_s6, %s781_s6 }
  0x5b   :  { %615 = vmatpush3.bf16.msra.mxu0 %v714_v29  ;;  %p788_p13 = por %p787_p12, %p786_p11 }
  0x5d   :  { %p789_p0 = pnand %p788_p13, %p782_p10 }
 0x110   :  { %v125_v19 = vpop.f32.mrb[0].mxu0 }
 0x111   :  { %v139_v20 = vsub.f32 %v125_v19, %v505_v18  ;;  %v578_v21 = vpop.f32.mrb[1].mxu0 }
 0x112   :  { %v128_v22 = vpop.f32.mrb[2].mxu0 }
 0x113   :  { %v141_v23 = vand.u32 2147483647, %v139_v20  ;;  %v140_v24 = vsub.f32 %v128_v22, %v505_v18  ;;  %v579_v25 = vpop.f32.mrb[3].mxu0 }
 0x115   :  { %v142_v26 = vand.u32 2147483647, %v140_v24  ;;  %vm143_vm3 = vcmp.lt.f32.partialorder %v141_v23, 0.5 }
 0x117   :  { %vm144_vm4 = vcmp.lt.f32.partialorder %v142_v26, 0.5 }
 0x118   :  { %vm515_vm5 = vmpackc.low %vm144_vm4, %vm143_vm3 }
 0x119   :  { %597 = vmatmul.mubr.msk.bf16.vlgmr.msra.gmra.mrb[0].mxu1 %vm515_vm5, %v818_v27 }
 0x11a   :  { %658 = vmatpush3.bf16.msra.mxu1 %v655_v33 }
 0x11b   :  { %660 = vmatprep.subr.bf16.mxu1 %v659_v35 }
 0x11e   :  { %662 = vmatpush3.bf16.msra.mxu1 %v659_v35 }
 0x11f   :  { %664 = vmatprep.subr.bf16.mxu1 %v663_v38 }
 0x122   :  { %666 = vmatpush3.bf16.msra.mxu1 %v663_v38 }
 0x123   :  { %668 = vmatprep.subr.bf16.mxu1 %v667_v41 }
 0x126   :  { %670 = vmatpush3.bf16.msra.mxu1 %v667_v41 }
 0x127   :  { %672 = vmatprep.subr.bf16.mxu1 %v671_v44 }
 0x12a   :  { %674 = vmatpush3.bf16.msra.mxu1 %v671_v44 }
 0x12b   :  { %676 = vmatprep.subr.bf16.mxu1 %v675_v47 }
 0x12e   :  { %678 = vmatpush3.bf16.msra.mxu1 %v675_v47 }
 0x12f   :  { %680 = vmatprep.subr.bf16.mxu1 %v679_v50 }
 0x132   :  { %682 = vmatpush3.bf16.msra.mxu1 %v679_v50 }
 0x133   :  { %684 = vmatprep.subr.bf16.mxu1 %v683_v63 }
 0x136   :  { %686 = vmatpush3.bf16.msra.mxu1 %v683_v63 }
 0x1ec   :  { %v253_v52 = vpop.f32.mrb[0].mxu1 }
 0x1ed   :  { %v254_v53 = vadd.f32 %v506_v51, %v253_v52  ;;  %v598_v54 = vpop.f32.mrb[1].mxu1 }
 0x1ee   :  { %v256_v55 = vpop.f32.mrb[2].mxu1 }
 0x1ef   :  { %v257_v56 = vadd.f32 %v506_v51, %v256_v55  ;;  %v599_v57 = vpop.f32.mrb[3].mxu1  ;;  %v260_v58 = vmax.f32 %v254_v53, 0.0 }
 0x1f1   :  { %v261_v59 = vmax.f32 %v257_v56, 0.0 }
 0x1f3   :  { %v262_v60 = vpack.c.bf16 %v261_v59, %v260_v58 }
 0x1f5   :  { %617 = vmatmul.mubr.bf16.vlgmr.msra.gmra.mrb[4].mxu0 %v262_v60 }
 0x2c8   :  { %v368_v1 = vpop.f32.mrb[4].mxu0 }
 0x2c9   :  { %v369_v2 = vadd.f32 %v517_v0, %v368_v1  ;;  %v618_v3 = vpop.f32.mrb[5].mxu0 }
 0x2ca   :  { %v371_v4 = vpop.f32.mrb[6].mxu0 }
 0x2cb   :  { %v375_v5 = vmax.f32 %v369_v2, 0.0  ;;  %v372_v6 = vadd.f32 %v517_v0, %v371_v4  ;;  %v619_v7 = vpop.f32.mrb[7].mxu0 }
 0x2cd   :  { %v376_v8 = vmax.f32 %v372_v6, 0.0  ;;  %652 = vmatprep.mubr.f32.mxu1 %v375_v5 }
 0x2cf   :  { %653 = vmatmul.mubr.f32.vlgmr.msra.gmra.mrb[4].mxu1 %v376_v8 }
 0x3a2   :  { %v654_v10 = vpop.f32.mrb[4].mxu1 }
 0x3a3   :  { %v472_v11 = vadd.f32 %v654_v10, %v526_v9  ;;  %v466_v12 = vpop.f32.mrb[5].mxu1 }
 0x3a4   :  { %v467_v13 = vadd.f32 %v526_v9, %v466_v12 }
 0x3a6   :  { %v534_v14 = vpack.c.bf16 %v472_v11, %v467_v13 }
 0x3a8   :  { %535 = vst [vmem:[#allocation8] sm:$0xff] %v534_v14  }
 0x3a9   :  { %792 = shalt.err (!%p789_p0)
}
 0x3aa   :  { %s793_s8 = scalar_lea.hbm %s984_s9, 128 }
 0x3ab   :  { %p794_p1 = scmp.ne.s32.totalorder %s984_s9, %s793_s8  ;;  %p797_p2 = scmp.lt.u32.totalorder %s793_s8, %s984_s9 }
 0x3ad   :  { %p799_p3 = pnand %p797_p2, %p794_p1 }
 0x3af   :  { %802 = shalt.err (!%p799_p3)
}
 0x3b0   :  { %496 = dma.vmem_to_hbm [thread:$0]  %s491_s15, 128, %s984_s9, [#allocation4], %s811_s21, %s811_s21, %s812_s22  }
 0x3b1   :  { %807 = dma.done.wait [#allocation4], 128  }
 0x3b2   :  { %808 = vsyncadd [#allocation4], 4294967168 }
 0x3b3   :  { %500 = vsyncpa [#allocation3], 1 }
 0x3b4   :  { %501 = vsyncpa [#allocation6], 1 }
 0x3b5   :  { %502 = vsyncpa [#allocation4], 1 }

</bundles_post_ra>
